<compile_context>
chip_gen: v7x
topology: tpu7x:2x2x1
jax: 0.10.0
libtpu: 0.0.40
codegen_flags: <defaults>
</compile_context>

<pallas_src>
import functools
import math

import jax
import jax.numpy as jnp
from jax import lax
from jax.experimental import pallas as pl
from jax.experimental.pallas import tpu as pltpu


_VMEM_LIMIT_BYTES = 64 * 1024 * 1024  # above the 32 MiB scoped default


def _tile(dim, preferred):
    """Pick a legal tile: `preferred` if it divides `dim`, else full extent."""
    return preferred if dim % preferred == 0 else dim


# ---------------------------------------------------------------------------
# Kernel 1: tiled dense layer  y = x @ W^T + b
#   x: (tm, tk)  W: (tn, tk) (torch layout, consumed un-transposed)  b: (1, tn)
# ---------------------------------------------------------------------------
def _linear_kernel(x_ref, w_ref, b_ref, o_ref, acc_ref):
    k = pl.program_id(2)

    @pl.when(k == 0)
    def _():
        acc_ref[...] = jnp.zeros_like(acc_ref)

    # Contract dim 1 of x with dim 1 of W  ==  x @ W.T, fed to the MXU directly.
    acc_ref[...] += lax.dot_general(
        x_ref[...], w_ref[...],
        dimension_numbers=(((1,), (1,)), ((), ())),
        preferred_element_type=jnp.float32)

    @pl.when(k == pl.num_programs(2) - 1)
    def _():
        o_ref[...] = (acc_ref[...] + b_ref[...]).astype(o_ref.dtype)


def linear(x2d, w, b, *, tm=256, tn=256, tk=512):
    """x2d: (M, d_in); w: (d_out, d_in) torch-style; b: (d_out,)."""
    m, d_in = x2d.shape
    d_out = w.shape[0]
    tm = _tile(m, tm)
    tn = _tile(d_out, tn)
    tk = _tile(d_in, tk)
    grid = (m // tm, d_out // tn, d_in // tk)
    return pl.pallas_call(
        _linear_kernel,
        out_shape=jax.ShapeDtypeStruct((m, d_out), x2d.dtype),
        grid_spec=pltpu.PrefetchScalarGridSpec(
            num_scalar_prefetch=0,
            grid=grid,
            in_specs=[
                pl.BlockSpec((tm, tk), lambda i, j, k: (i, k)),
                pl.BlockSpec((tn, tk), lambda i, j, k: (j, k)),
                pl.BlockSpec((1, tn), lambda i, j, k: (0, j)),
            ],
            out_specs=pl.BlockSpec((tm, tn), lambda i, j, k: (i, j)),
            scratch_shapes=[pltpu.VMEM((tm, tn), jnp.float32)],
        ),
        compiler_params=pltpu.CompilerParams(
            dimension_semantics=("parallel", "parallel", "arbitrary"),
            vmem_limit_bytes=_VMEM_LIMIT_BYTES),
    )(x2d, w, b.reshape(1, d_out))


# ---------------------------------------------------------------------------
# Kernel 2: scaled-dot-product attention, one batch element per program.
# Heads stay folded in the lane dimension (blocks are (1, S, d_model)).
# ---------------------------------------------------------------------------
def _attention_kernel(q_ref, k_ref, v_ref, o_ref, *, h, d_k):
    scale = 1.0 / math.sqrt(d_k)
    q = q_ref[0]          # (S, d_model)
    k = k_ref[0]          # (S, d_model)
    v = v_ref[0]          # (S, d_model)

    ctxs = []
    for hd in range(h):
        lo = hd * d_k
        qh = q[:, lo:lo + d_k] * scale        # scale q (S*d_k), not scores (S*S)
        kh = k[:, lo:lo + d_k]
        vh = v[:, lo:lo + d_k]
        # q @ k^T without materializing a transpose.
        scores = lax.dot_general(
            qh, kh, dimension_numbers=(((1,), (1,)), ((), ())),
            preferred_element_type=jnp.float32)           # (S, S)
        m = jnp.max(scores, axis=-1, keepdims=True)
        p = jnp.exp(scores - m)
        l = jnp.sum(p, axis=-1, keepdims=True)
        ctx = jnp.dot(p.astype(vh.dtype), vh,
                      preferred_element_type=jnp.float32)  # (S, d_k)
        # Defer normalization to the (S, d_k) context; EUP approx reciprocal.
        ctxs.append(ctx * pl.reciprocal(l, approx=True))

    # Single lane-dense store of all heads (already in the merged layout,
    # i.e. the transpose(1,2).view(bs,-1,h*d_k) of the torch module).
    o_ref[0] = jnp.concatenate(ctxs, axis=-1).astype(o_ref.dtype)


def attention(q, k, v, h):
    """q/k/v: (bs, S, d_model) with heads folded in the last dim."""
    bs, s, d_model = q.shape
    d_k = d_model // h
    spec = pl.BlockSpec((1, s, d_model), lambda b: (b, 0, 0))
    return pl.pallas_call(
        functools.partial(_attention_kernel, h=h, d_k=d_k),
        out_shape=jax.ShapeDtypeStruct((bs, s, d_model), q.dtype),
        grid=(bs,),
        in_specs=[spec, spec, spec],
        out_specs=spec,
        compiler_params=pltpu.CompilerParams(
            dimension_semantics=("parallel",),
            vmem_limit_bytes=_VMEM_LIMIT_BYTES),
    )(q, k, v)


# ---------------------------------------------------------------------------
# MultiHeadedAttention forward (glue in plain JAX, hot paths in Pallas)
# ---------------------------------------------------------------------------
def multi_headed_attention(query, key, value, params, h):
    bs, s, d_model = query.shape

    # Projections: three separate inputs (module signature allows q != k != v),
    # each via the tiled linear kernel.  No head-split transposes: heads stay
    # in the lane dimension end to end.
    q2 = linear(query.reshape(bs * s, d_model), params["wq"], params["bq"])
    k2 = linear(key.reshape(bs * s, d_model), params["wk"], params["bk"])
    v2 = linear(value.reshape(bs * s, d_model), params["wv"], params["bv"])

    ctx = attention(q2.reshape(bs, s, d_model),
                    k2.reshape(bs, s, d_model),
                    v2.reshape(bs, s, d_model), h)          # (bs, S, d_model)

    out = linear(ctx.reshape(bs * s, d_model), params["wo"], params["bo"])
    return out.reshape(bs, s, d_model)


# ---------------------------------------------------------------------------
# Deterministic parameter init (mimics nn.Linear's uniform(-1/sqrt(in), ...))
# ---------------------------------------------------------------------------
def init_params(key, d_model):
    bound = 1.0 / math.sqrt(d_model)
    names = ["q", "k", "v", "o"]
    params = {}
    keys = jax.random.split(key, 2 * len(names))
    for i, n in enumerate(names):
        params["w" + n] = jax.random.uniform(
            keys[2 * i], (d_model, d_model), jnp.float32, -bound, bound)
        params["b" + n] = jax.random.uniform(
            keys[2 * i + 1], (d_model,), jnp.float32, -bound, bound)
    return params


# ---------------------------------------------------------------------------
# Pure-JAX reference for a sanity check
# ---------------------------------------------------------------------------
def reference(query, key, value, params, h):
    bs, s, d_model = query.shape
    d_k = d_model // h

    def proj(x, w, b):
        return (x @ w.T + b).reshape(bs, s, h, d_k).transpose(0, 2, 1, 3)

    qh = proj(query, params["wq"], params["bq"])
    kh = proj(key, params["wk"], params["bk"])
    vh = proj(value, params["wv"], params["bv"])
    scores = jnp.einsum("bhqd,bhkd->bhqk", qh, kh) / math.sqrt(d_k)
    p = jax.nn.softmax(scores, axis=-1)
    ctx = jnp.einsum("bhqk,bhkd->bhqd", p, vh)
    x = ctx.transpose(0, 2, 1, 3).reshape(bs, s, d_model)
    return x @ params["wo"].T + params["bo"]


if __name__ == "__main__":
    bs, seq, h, d_model = 2, 8, 4, 32

    key0 = jax.random.PRNGKey(0)
    kq, kk, kv, kp = jax.random.split(key0, 4)
    q = jax.random.normal(kq, (bs, seq, d_model), jnp.float32)
    k = jax.random.normal(kk, (bs, seq, d_model), jnp.float32)
    v = jax.random.normal(kv, (bs, seq, d_model), jnp.float32)
    params = init_params(kp, d_model)

    out = multi_headed_attention(q, k, v, params, h)
    out = jax.block_until_ready(out)

    ref = reference(q, k, v, params, h)
    assert out.shape == (bs, seq, d_model)
    assert jnp.allclose(out, ref, atol=2e-3, rtol=2e-3)

    print("KERNEL_OK")
</pallas_src>

<mosaic_0001>
module attributes {stable_mosaic.version = 11 : i64} {
  func.func @_linear_kernel(%arg0: i32, %arg1: i32, %arg2: i32, %arg3: memref<16x32xf32, #tpu.memory_space<vmem>>, %arg4: memref<32x32xf32, #tpu.memory_space<vmem>>, %arg5: memref<1x32xf32, #tpu.memory_space<vmem>>, %arg6: memref<16x32xf32, #tpu.memory_space<vmem>>, %arg7: memref<16x32xf32, #tpu.memory_space<vmem>>) attributes {dimension_semantics = [#tpu.dimension_semantics<parallel>, #tpu.dimension_semantics<parallel>, #tpu.dimension_semantics<arbitrary>], iteration_bounds = array<i64: 1, 1, 1>, scalar_prefetch = 0 : i64, scratch_operands = 1 : i64, tpu.core_type = #tpu.core_type<tc>, window_params = [{transform_indices = @transform_0, window_bounds = array<i64: 16, 32>}, {transform_indices = @transform_1, window_bounds = array<i64: 32, 32>}, {transform_indices = @transform_2, window_bounds = array<i64: 1, 32>}, {transform_indices = @transform_3, window_bounds = array<i64: 16, 32>}]} {
    %c0_i32 = arith.constant 0 : i32
    %0 = arith.cmpi eq, %arg2, %c0_i32 : i32
    %1 = arith.extui %0 : i1 to i32
    %c0_i32_0 = arith.constant 0 : i32
    %2 = arith.cmpi ne, %1, %c0_i32_0 : i32
    scf.if %2 {
      %cst_10 = arith.constant 0.000000e+00 : f32
      %12 = vector.broadcast %cst_10 : f32 to vector<16x32xf32>
      %c0_11 = arith.constant 0 : index
      %c0_12 = arith.constant 0 : index
      %13 = vector.load %arg7[%c0_11, %c0_12] : memref<16x32xf32, #tpu.memory_space<vmem>>, vector<16x32xf32>
      tpu.vector_store %arg7[%c0_11, %c0_12], %12 {strides = array<i32>} : memref<16x32xf32, #tpu.memory_space<vmem>>, vector<16x32xf32>,
    } else {
    }
    %c0 = arith.constant 0 : index
    %c0_1 = arith.constant 0 : index
    %3 = vector.load %arg7[%c0, %c0_1] : memref<16x32xf32, #tpu.memory_space<vmem>>, vector<16x32xf32>
    %c0_2 = arith.constant 0 : index
    %c0_3 = arith.constant 0 : index
    %4 = vector.load %arg3[%c0_2, %c0_3] : memref<16x32xf32, #tpu.memory_space<vmem>>, vector<16x32xf32>
    %c0_4 = arith.constant 0 : index
    %c0_5 = arith.constant 0 : index
    %5 = vector.load %arg4[%c0_4, %c0_5] : memref<32x32xf32, #tpu.memory_space<vmem>>, vector<32x32xf32>
    %cst = arith.constant dense<0.000000e+00> : vector<16x32xf32>
    %6 = tpu.matmul %4, %5, %cst {dimension_numbers = #tpu.dot_dimension_numbers<[1], [1], [0], [0], [0, 0, 1, 0], [], []>} : vector<16x32xf32>, vector<32x32xf32>, vector<16x32xf32> -> vector<16x32xf32>
    %7 = arith.addf %3, %6 : vector<16x32xf32>
    %c0_6 = arith.constant 0 : index
    %c0_7 = arith.constant 0 : index
    %8 = vector.load %arg7[%c0_6, %c0_7] : memref<16x32xf32, #tpu.memory_space<vmem>>, vector<16x32xf32>
    tpu.vector_store %arg7[%c0_6, %c0_7], %7 {strides = array<i32>} : memref<16x32xf32, #tpu.memory_space<vmem>>, vector<16x32xf32>,
    %c0_i32_8 = arith.constant 0 : i32
    %9 = arith.cmpi eq, %arg2, %c0_i32_8 : i32
    %10 = arith.extui %9 : i1 to i32
    %c0_i32_9 = arith.constant 0 : i32
    %11 = arith.cmpi ne, %10, %c0_i32_9 : i32
    scf.if %11 {
      %c0_10 = arith.constant 0 : index
      %c0_11 = arith.constant 0 : index
      %12 = vector.load %arg7[%c0_10, %c0_11] : memref<16x32xf32, #tpu.memory_space<vmem>>, vector<16x32xf32>
      %c0_12 = arith.constant 0 : index
      %c0_13 = arith.constant 0 : index
      %13 = vector.load %arg5[%c0_12, %c0_13] : memref<1x32xf32, #tpu.memory_space<vmem>>, vector<1x32xf32>
      %14 = vector.broadcast %13 : vector<1x32xf32> to vector<16x32xf32>
      %15 = arith.addf %12, %14 : vector<16x32xf32>
      %c0_14 = arith.constant 0 : index
      %c0_15 = arith.constant 0 : index
      %16 = vector.load %arg6[%c0_14, %c0_15] : memref<16x32xf32, #tpu.memory_space<vmem>>, vector<16x32xf32>
      tpu.vector_store %arg6[%c0_14, %c0_15], %15 {strides = array<i32>} : memref<16x32xf32, #tpu.memory_space<vmem>>, vector<16x32xf32>,
    } else {
    }
    return
  }
  func.func @transform_0(%arg0: i32, %arg1: i32, %arg2: i32) -> (i32, i32) {
    %c0_i32 = arith.constant 0 : i32
    return %arg0, %arg2 : i32, i32
  }
  func.func @transform_1(%arg0: i32, %arg1: i32, %arg2: i32) -> (i32, i32) {
    %c0_i32 = arith.constant 0 : i32
    return %arg1, %arg2 : i32, i32
  }
  func.func @transform_2(%arg0: i32, %arg1: i32, %arg2: i32) -> (i32, i32) {
    %c0_i32 = arith.constant 0 : i32
    %c0_i32_0 = arith.constant 0 : i32
    return %c0_i32, %arg1 : i32, i32
  }
  func.func @transform_3(%arg0: i32, %arg1: i32, %arg2: i32) -> (i32, i32) {
    %c0_i32 = arith.constant 0 : i32
    return %arg0, %arg1 : i32, i32
  }
}

</mosaic_0001>

<bundles_post_ra>
// kernel: tpu_custom_call.1
= control target key start
LH: loop header
LB: loop body
LE: loop exit
PB: predicated region body
PF: predicated region fallthrough
CT: control target
= control target key end

     0   :  { %8 = vsyncpa [#allocation4], 0  ;;  %s439_s0 = inlined_call_operand.hbm [shape: f32[16,32], index: 0, kind: input, shape index: {}]   ;;  %s440_s1 = inlined_call_operand.hbm [shape: f32[32,32], index: 1, kind: input, shape index: {}]   ;;  %s441_s2 = inlined_call_operand.hbm [shape: f32[1,32], index: 2, kind: input, shape index: {}]   ;;  %s442_s3 = inlined_call_operand.hbm [shape: f32[16,32], index: 3, kind: output, shape index: {}]  }
   0x1   :  { %9 = vsyncpa [#allocation7], 0 }
   0x2   :  { %10 = vsyncpa [#allocation5], 0  ;;  %s338_s12 = smov [#allocation6]   ;;  %s339_s14 = smov [#allocation3]  }
   0x3   :  { %s28_s13 = sshll.u32 %s338_s12, 4  ;;  %s16_s15 = sshll.u32 %s339_s14, 4  ;;  %s29_s13 = int_to_ptr.vmem [resolvable:$true] %s28_s13  ;;  %s365_s15 = int_to_ptr.vmem [resolvable:$true] %s16_s15 }
   0x4   :  { %s244_s18 = scalar_lea.hbm %s440_s1, 512 }
   0x5   :  { %p245_p0 = scmp.ne.s32.totalorder %s440_s1, %s244_s18  ;;  %p248_p1 = scmp.lt.u32.totalorder %s244_s18, %s440_s1 }
   0x7   :  { %p250_p2 = pnand %p248_p1, %p245_p0 }
   0x9   :  { %253 = shalt.err (!%p250_p2)
}
   0xa   :  { %s254_s23 = scalar_lea.vmem %s29_s13, 512  ;;  %p259_p4 = scmp.lt.s32.totalorder %s29_s13, %s29_s13 }
   0xb   :  { %p255_p3 = scmp.ne.s32.totalorder %s29_s13, %s254_s23  ;;  %p260_p5 = scmp.lt.s32.totalorder %s254_s23, %s254_s23 }
   0xd   :  { %p261_p6 = por %p260_p5, %p259_p4 }
   0xf   :  { %p262_p7 = pnand %p261_p6, %p255_p3 }
  0x11   :  { %265 = shalt.err (!%p262_p7)
}
  0x12   :  { %s340_s24 = smov 128   ;;  %s341_s25 = smov 8  }
  0x13   :  { %34 = dma.hbm_to_vmem [thread:$0]  %s440_s1, 512, %s29_s13, [#allocation7], %s340_s24, %s340_s24, %s341_s25  }
  0x14   :  { %s266_s30 = scalar_lea.hbm %s439_s0, 256 }
  0x15   :  { %p267_p8 = scmp.ne.s32.totalorder %s439_s0, %s266_s30  ;;  %p270_p9 = scmp.lt.u32.totalorder %s266_s30, %s439_s0 }
  0x17   :  { %p272_p10 = pnand %p270_p9, %p267_p8 }
  0x19   :  { %275 = shalt.err (!%p272_p10)
}
  0x1a   :  { %s276_s8 = scalar_lea.vmem %s365_s15, 256  ;;  %p281_p12 = scmp.lt.s32.totalorder %s365_s15, %s365_s15 }
  0x1b   :  { %p277_p11 = scmp.ne.s32.totalorder %s365_s15, %s276_s8  ;;  %p282_p13 = scmp.lt.s32.totalorder %s276_s8, %s276_s8 }
  0x1d   :  { %p283_p0 = por %p282_p13, %p281_p12 }
  0x1f   :  { %p284_p1 = pnand %p283_p0, %p277_p11 }
  0x21   :  { %287 = shalt.err (!%p284_p1)
}
  0x22   :  { %22 = dma.hbm_to_vmem [thread:$0]  %s439_s0, 256, %s365_s15, [#allocation4], %s340_s24, %s340_s24, %s341_s25  }
  0x23   :  { %s342_s10 = smov [#allocation8]   ;;  %s288_s14 = scalar_lea.hbm %s441_s2, 16 }
  0x24   :  { %s41_s11 = sshll.u32 %s342_s10, 4  ;;  %p289_p2 = scmp.ne.s32.totalorder %s441_s2, %s288_s14  ;;  %s42_s11 = int_to_ptr.vmem [resolvable:$true] %s41_s11 }
  0x25   :  { %p292_p3 = scmp.lt.u32.totalorder %s288_s14, %s441_s2 }
  0x27   :  { %p294_p4 = pnand %p292_p3, %p289_p2 }
  0x29   :  { %297 = shalt.err (!%p294_p4)
}
  0x2a   :  { %s298_s20 = scalar_lea.vmem %s42_s11, 16  ;;  %s302_s0 = scalar_lea.vmem %s42_s11, 32 }
  0x2b   :  { %p299_p5 = scmp.ne.s32.totalorder %s42_s11, %s298_s20  ;;  %p303_p6 = scmp.lt.s32.totalorder %s42_s11, %s42_s11 }
  0x2c   :  { %p304_p7 = scmp.lt.s32.totalorder %s302_s0, %s298_s20 }
  0x2e   :  { %p305_p8 = por %p304_p7, %p303_p6 }
  0x30   :  { %p306_p9 = pnand %p305_p8, %p299_p5 }
  0x32   :  { %309 = shalt.err (!%p306_p9)
}
  0x33   :  { %44 = dma.hbm_to_vmem [thread:$0]  %s441_s2, 16, %s42_s11, [#allocation7]  }
  0x34   :  { %332 = dma.done.wait [#allocation4], 256  }
  0x35   :  { %333 = vsyncadd [#allocation4], 4294967040 }
  0x36   :  { %334 = dma.done.wait [#allocation7], 528  }
  0x37   :  { %335 = vsyncadd [#allocation7], 4294966768  ;;  %vm58_vm0 = vcmask 261120   ;;  %v343_v0 = vmov 0.0   ;;  %v65_v1 = vld [vmem:[#allocation6] sm:$0xff]  ;;  %v66_v2 = vld [vmem:[#allocation6 + $0x8] sm:$0xff] }
  0x38   :  { %60 = vst.msk [vmem:[#allocation2 + $0x8] sm:$0xff] %vm58_vm0, %v343_v0  ;;  %59 = vst.msk [vmem:[#allocation2] sm:$0xff] %vm58_vm0, %v343_v0  ;;  %v67_v3 = vld [vmem:[#allocation6 + $0x10] sm:$0xff]  ;;  %v225_v4 = vpack.c.bf16 %v66_v2, %v65_v1  ;;  %v68_v5 = vld [vmem:[#allocation6 + $0x18] sm:$0xff]  ;;  %s344_s2 = smov [#allocation9]  }
  0x39   :  { %vm226_vm1 = vmpackc.low %vm58_vm0, %vm58_vm0  ;;  %v63_v6 = vld [vmem:[#allocation3] sm:$0xff]  ;;  %v231_v7 = vpack.c.bf16 %v68_v5, %v67_v3  ;;  %v64_v8 = vld [vmem:[#allocation3 + $0x8] sm:$0xff]  ;;  %s188_s22 = sshll.u32 %s344_s2, 4  ;;  %s189_s22 = int_to_ptr.vmem [resolvable:$true] %s188_s22 }
  0x3a   :  { %222 = vmatprep.mubr.msk.f32.mxu0 %vm58_vm0, %v63_v6  ;;  %227 = vmatprep.subr.msk.bf16.mxu0 %vm226_vm1, %v225_v4  ;;  %v207_v15 = vld [vmem:[#allocation8] ss:$0 sm:$0xff]  ;;  %s310_s23 = scalar_lea.vmem %s189_s22, 256  ;;  %p315_p11 = scmp.lt.s32.totalorder %s189_s22, %s189_s22 }
  0x3b   :  { %230 = vmatpush3.bf16.xpose.msk.msra.mxu0 %vm226_vm1, %v225_v4  ;;  %p311_p10 = scmp.ne.s32.totalorder %s189_s22, %s310_s23  ;;  %p316_p12 = scmp.lt.s32.totalorder %s310_s23, %s310_s23 }
  0x3c   :  { %233 = vmatprep.subr.msk.bf16.mxu0 %vm226_vm1, %v231_v7 }
  0x3d   :  { %p317_p13 = por %p316_p12, %p315_p11 }
  0x3f   :  { %v62_v9 = vld [vmem:[#allocation2 + $0x8] sm:$0xff]  ;;  %v61_v10 = vld [vmem:[#allocation2] sm:$0xff]  ;;  %p318_p0 = pnand %p317_p13, %p311_p10 }
  0x43   :  { %236 = vmatpush3.bf16.xpose.msk.msra.mxu0 %vm226_vm1, %v231_v7 }
  0x4a   :  { %223 = vmatmul.mubr.msk.f32.vlgmr.msra.gmra.mrb[0].mxu0 %vm58_vm0, %v64_v8 }
 0x11d   :  { %v224_v11 = vpop.f32.mrb[0].mxu0 }
 0x11e   :  { %v164_v12 = vadd.f32 %v224_v11, %v62_v9  ;;  %v154_v13 = vpop.f32.mrb[1].mxu0 }
 0x11f   :  { %v163_v14 = vadd.f32 %v154_v13, %v61_v10 }
 0x120   :  { %166 = vst.msk [vmem:[#allocation2 + $0x8] sm:$0xff] %vm58_vm0, %v164_v12 }
 0x121   :  { %165 = vst.msk [vmem:[#allocation2] sm:$0xff] %vm58_vm0, %v163_v14 }
 0x127   :  { %v171_v16 = vld [vmem:[#allocation2 + $0x8] sm:$0xff] }
 0x128   :  { %v170_v17 = vld [vmem:[#allocation2] sm:$0xff]  ;;  %v180_v18 = vadd.f32 %v207_v15, %v171_v16 }
 0x129   :  { %v179_v19 = vadd.f32 %v207_v15, %v170_v17 }
 0x12a   :  { %182 = vst.msk [vmem:[#allocation9 + $0x8] sm:$0xff] %vm58_vm0, %v180_v18 }
 0x12b   :  { %181 = vst.msk [vmem:[#allocation9] sm:$0xff] %vm58_vm0, %v179_v19 }
 0x12c   :  { %321 = shalt.err (!%p318_p0)
}
 0x12d   :  { %s322_s28 = scalar_lea.hbm %s442_s3, 256 }
 0x12e   :  { %p323_p1 = scmp.ne.s32.totalorder %s442_s3, %s322_s28  ;;  %p326_p2 = scmp.lt.u32.totalorder %s322_s28, %s442_s3 }
 0x130   :  { %p328_p3 = pnand %p326_p2, %p323_p1 }
 0x132   :  { %331 = shalt.err (!%p328_p3)
}
 0x133   :  { %194 = dma.vmem_to_hbm [thread:$0]  %s189_s22, 256, %s442_s3, [#allocation5], %s340_s24, %s340_s24, %s341_s25  }
 0x134   :  { %336 = dma.done.wait [#allocation5], 256  }
 0x135   :  { %337 = vsyncadd [#allocation5], 4294967040 }
 0x136   :  { %198 = vsyncpa [#allocation4], 1 }
 0x137   :  { %199 = vsyncpa [#allocation7], 1 }
 0x138   :  { %200 = vsyncpa [#allocation5], 1 }

</bundles_post_ra>
